<compile_context>
chip_gen: v7x
topology: tpu7x:2x2x1
jax: 0.10.0
libtpu: 0.0.40
codegen_flags: <defaults>
</compile_context>

<pallas_src>
import jax
import jax.numpy as jnp
from jax.experimental import pallas as pl
from jax.experimental.pallas import tpu as pltpu


# Split the copy into at most this many concurrent DMAs...
_MAX_CHUNKS = 8
# ...but never make a chunk smaller than ~1 MiB (descriptor overhead).
_CHUNK_MIN_BYTES = 1 * 1024 * 1024


def _chunk_bounds(dim0, nbytes):
    """Static (start, size) ranges along dim 0 for concurrent DMA chunks."""
    if dim0 < 2 or nbytes < 2 * _CHUNK_MIN_BYTES:
        return ((0, dim0),)
    n_chunks = min(_MAX_CHUNKS, dim0, max(1, nbytes // _CHUNK_MIN_BYTES))
    if n_chunks < 2:
        return ((0, dim0),)
    base, rem = divmod(dim0, n_chunks)
    bounds, start = [], 0
    for i in range(n_chunks):
        size = base + (1 if i < rem else 0)
        bounds.append((start, size))
        start += size
    return tuple(bounds)


def _make_copy_kernel(bounds):
    """Kernel body: start all HBM->HBM DMAs, then wait on all of them."""

    def kernel(x_hbm, o_hbm, sems):
        copies = [
            pltpu.make_async_copy(
                x_hbm.at[pl.ds(start, size)],
                o_hbm.at[pl.ds(start, size)],
                sems.at[i],
            )
            for i, (start, size) in enumerate(bounds)
        ]
        for cp in copies:   # issue all copies first so they run concurrently
            cp.start()
        for cp in copies:
            cp.wait()

    return kernel


def identity(x, donate=False):
    """Pallas Identity.

    donate=True : returns `x` itself (zero HBM traffic, like torch Identity).
    donate=False: returns a fresh copy produced by direct HBM->HBM DMA
                  (no VMEM bounce, no grid, no padding).
    """
    if donate or x.ndim == 0 or x.size == 0:
        # Nothing to materialise: the module's forward is literally `return x`.
        return x

    nbytes = x.size * jnp.dtype(x.dtype).itemsize
    bounds = _chunk_bounds(x.shape[0], nbytes)

    return pl.pallas_call(
        _make_copy_kernel(bounds),
        out_shape=jax.ShapeDtypeStruct(x.shape, x.dtype),
        in_specs=[pl.BlockSpec(memory_space=pl.ANY)],   # raw HBM ref, no auto-DMA
        out_specs=pl.BlockSpec(memory_space=pl.ANY),    # raw HBM ref, no auto-DMA
        scratch_shapes=[pltpu.SemaphoreType.DMA((len(bounds),))],
        cost_estimate=pl.CostEstimate(
            flops=0, transcendentals=0, bytes_accessed=2 * nbytes),
    )(x)


if __name__ == "__main__":
    key = jax.random.PRNGKey(0)
    # NCHW input, consistent with the module's typical usage in a conv stack.
    x = jax.random.normal(key, (2, 4, 16, 16), dtype=jnp.float32)

    y = identity(x)
    jax.block_until_ready(y)
    assert y.shape == x.shape, (y.shape, x.shape)
    assert y.dtype == x.dtype, (y.dtype, x.dtype)
    assert bool(jnp.array_equal(y, x)), "identity output mismatch"

    # Ragged, sub-32-bit dtype: exercised directly by the DMA path (no padding).
    x2 = jax.random.normal(jax.random.PRNGKey(1), (3, 5, 7), dtype=jnp.bfloat16)
    y2 = identity(x2)
    jax.block_until_ready(y2)
    assert y2.shape == x2.shape and y2.dtype == x2.dtype
    assert bool(jnp.array_equal(y2, x2)), "identity (ragged bf16) mismatch"

    # Donated path: genuine zero-traffic identity (returns the same array).
    y3 = identity(x, donate=True)
    assert y3 is x

    print("KERNEL_OK")
</pallas_src>

<mosaic_0001>
module attributes {stable_mosaic.version = 11 : i64} {
  func.func @kernel(%arg0: memref<2x4x16x16xf32, #tpu.memory_space<any>>, %arg1: memref<2x4x16x16xf32, #tpu.memory_space<any>>, %arg2: memref<1x!tpu.dma_semaphore, #tpu.memory_space<semaphore_mem>>) attributes {dimension_semantics = [], scalar_prefetch = 0 : i64, scratch_operands = 1 : i64, tpu.core_type = #tpu.core_type<tc>} {
    %c0_i32 = arith.constant 0 : i32
    %c0_i32_0 = arith.constant 0 : i32
    %c0_i32_1 = arith.constant 0 : i32
    %c0_i32_2 = arith.constant 0 : i32
    %c0_i32_3 = arith.constant 0 : i32
    %0 = tpu.memref_slice %arg0[%c0_i32_0, %c0_i32_1, %c0_i32_2, %c0_i32_3] : memref<2x4x16x16xf32, #tpu.memory_space<any>> -> memref<2x4x16x16xf32, #tpu.memory_space<any>>
    %c0_i32_4 = arith.constant 0 : i32
    %c0_i32_5 = arith.constant 0 : i32
    %c0_i32_6 = arith.constant 0 : i32
    %c0_i32_7 = arith.constant 0 : i32
    %1 = tpu.memref_slice %arg1[%c0_i32_4, %c0_i32_5, %c0_i32_6, %c0_i32_7] : memref<2x4x16x16xf32, #tpu.memory_space<any>> -> memref<2x4x16x16xf32, #tpu.memory_space<any>>
    %2 = tpu.memref_slice %arg2[%c0_i32] : memref<1x!tpu.dma_semaphore, #tpu.memory_space<semaphore_mem>> -> memref<1x!tpu.dma_semaphore, #tpu.memory_space<semaphore_mem>>
    %3 = tpu.memref_squeeze %2 : memref<1x!tpu.dma_semaphore, #tpu.memory_space<semaphore_mem>> -> memref<!tpu.dma_semaphore, #tpu.memory_space<semaphore_mem>>
    tpu.enqueue_dma source(%0 : memref<2x4x16x16xf32, #tpu.memory_space<any>>) target(%1 : memref<2x4x16x16xf32, #tpu.memory_space<any>>) target_semaphore(%3 : memref<!tpu.dma_semaphore, #tpu.memory_space<semaphore_mem>>)
    %c0_i32_8 = arith.constant 0 : i32
    %c0_i32_9 = arith.constant 0 : i32
    %c0_i32_10 = arith.constant 0 : i32
    %c0_i32_11 = arith.constant 0 : i32
    %c0_i32_12 = arith.constant 0 : i32
    %4 = tpu.memref_slice %arg0[%c0_i32_9, %c0_i32_10, %c0_i32_11, %c0_i32_12] : memref<2x4x16x16xf32, #tpu.memory_space<any>> -> memref<2x4x16x16xf32, #tpu.memory_space<any>>
    %c0_i32_13 = arith.constant 0 : i32
    %c0_i32_14 = arith.constant 0 : i32
    %c0_i32_15 = arith.constant 0 : i32
    %c0_i32_16 = arith.constant 0 : i32
    %5 = tpu.memref_slice %arg1[%c0_i32_13, %c0_i32_14, %c0_i32_15, %c0_i32_16] : memref<2x4x16x16xf32, #tpu.memory_space<any>> -> memref<2x4x16x16xf32, #tpu.memory_space<any>>
    %6 = tpu.memref_slice %arg2[%c0_i32_8] : memref<1x!tpu.dma_semaphore, #tpu.memory_space<semaphore_mem>> -> memref<1x!tpu.dma_semaphore, #tpu.memory_space<semaphore_mem>>
    %7 = tpu.memref_squeeze %6 : memref<1x!tpu.dma_semaphore, #tpu.memory_space<semaphore_mem>> -> memref<!tpu.dma_semaphore, #tpu.memory_space<semaphore_mem>>
    tpu.wait_dma2 semaphore(%7 : memref<!tpu.dma_semaphore, #tpu.memory_space<semaphore_mem>>) src(%4 : memref<2x4x16x16xf32, #tpu.memory_space<any>>) dst(%5 : memref<2x4x16x16xf32, #tpu.memory_space<any>>)
    return
  }
}

</mosaic_0001>

<bundles_post_ra>
// kernel: tpu_custom_call.1
= control target key start
LH: loop header
LB: loop body
LE: loop exit
PB: predicated region body
PF: predicated region fallthrough
CT: control target
= control target key end

     0   :  { %s36_s6 = smov [#allocation2]   ;;  %s37_s7 = smov [#allocation3]   ;;  %s55_s0 = inlined_call_operand.hbm [shape: f32[2,4,16,16], index: 0, kind: input, shape index: {}]   ;;  %s56_s1 = inlined_call_operand.hbm [shape: f32[2,4,16,16], index: 1, kind: output, shape index: {}]  }
   0x1   :  { %s38_s8 = smov 0  }
   0x2   :  { %18 = dma.general %s55_s0, 2048, %s56_s1, %s36_s6, %s37_s7, [#allocation4], %s38_s8, 0  }
   0x3   :  { %34 = dma.done.wait [#allocation2], 2048 }
   0x4   :  { %35 = vsyncadd [#allocation2], 4294965248 }
   0x5   :  { %24 = vsyncmov [#allocation2] }
   0x8   :  { %s25_s13 = vpop.sfrf %24 }
   0x9   :  { %p30_p0 = scmp.ne.s32.totalorder %s25_s13, 0 }
   0xb   :  { %29 = shalt.err (%p30_p0)  }

</bundles_post_ra>
